<compile_context>
chip_gen: v7x
topology: tpu7x:2x2x1
jax: 0.10.0
libtpu: 0.0.40
codegen_flags: <defaults>
</compile_context>

<pallas_src>
import functools

import jax
import jax.numpy as jnp
from jax.experimental import pallas as pl
from jax.experimental.pallas import tpu as pltpu


# ---------------------------------------------------------------------------
# Helpers
# ---------------------------------------------------------------------------
def _l2_normalize(x, axis):
    # Faithful to the module's own l2_normalize: the SQUARED sum is clamped at
    # 1e-12 (this is what the PyTorch reference does, not F.normalize).
    square_sum = jnp.sum(x * x, axis=axis, keepdims=True)
    inv_norm = jax.lax.rsqrt(jnp.maximum(square_sum, 1e-12))
    return x * inv_norm


def _round_up(x, m):
    return ((x + m - 1) // m) * m


def _vmem_capacity_bytes():
    try:
        info = pltpu.get_tpu_info()
        cap = getattr(info, "vmem_capacity_bytes", None)
        if cap:
            return int(cap)
    except Exception:
        pass
    return 64 * 1024 * 1024  # conservative fallback (v7x per-core VMEM)


def _pick_batch_tile(batch, per_row_bytes, fixed_bytes, budget_bytes):
    """Largest batch tile (multiple of 8) whose pipelined buffers fit budget."""
    avail = max(budget_bytes - fixed_bytes, 8 * per_row_bytes)
    bt_max = max(avail // per_row_bytes, 8)
    bt_max = min(bt_max, 512)  # >=512-row tiles already reach ~85% of roofline
    if batch <= bt_max:
        return int(batch)
    return int(max((bt_max // 8) * 8, 8))


# ---------------------------------------------------------------------------
# Fused kernel: seq-max pooling + L2 normalize + single similarity matmul
# ---------------------------------------------------------------------------
def _sim_kernel(text_embed_ref, img_embed_ref, key_norm_ref,
                embed_norm_ref, sim_ref):
    f32 = jnp.float32
    # embedding_key == 'cls' with cls_features=None -> max over the seq axis.
    # (Inputs may be bf16 in HBM; math is done in f32 in VMEM.)
    text_max = jnp.max(text_embed_ref[...].astype(f32), axis=1)   # (bt, Dp)
    img_max = jnp.max(img_embed_ref[...].astype(f32), axis=1)     # (bt, Dp)
    bt = text_max.shape[0]

    # Stack both modalities so the two similarity matmuls collapse into ONE
    # MXU push/pop: (2*bt, Dp) contracted against the precomputed, already
    # L2-normalized keys (Kpad, Dp) on Dp.
    embed_stacked = jnp.concatenate([text_max, img_max], axis=0)  # (2bt, Dp)
    embed_norm = _l2_normalize(embed_stacked, axis=1)             # (2bt, Dp)

    sim = jax.lax.dot_general(
        embed_norm, key_norm_ref[...],
        dimension_numbers=(((1,), (1,)), ((), ())),   # contract Dp, no .T
        preferred_element_type=jnp.float32)                       # (2bt, Kpad)

    embed_norm_ref[0, :, :] = embed_norm[:bt]
    embed_norm_ref[1, :, :] = embed_norm[bt:]
    sim_ref[0, :, :] = sim[:bt]
    sim_ref[1, :, :] = sim[bt:]


def _run_sim_kernel(text_embed, img_embed, key_norm_pad):
    B, S, Dp = text_embed.shape
    Kpad = key_norm_pad.shape[0]
    in_itemsize = jnp.dtype(text_embed.dtype).itemsize

    # VMEM-aware tile selection (works for 64 MiB v7x and 128 MiB v5e/v6e).
    vmem_cap = _vmem_capacity_bytes()
    budget = vmem_cap // 2
    # Per batch-row cost of the pipelined buffers: 2 inputs + 2 f32 outputs,
    # each double-buffered; plus the fixed (grid-invariant) key block.
    per_row = 4 * S * Dp * in_itemsize + 16 * Dp + 16 * Kpad
    fixed = 2 * Kpad * Dp * 4
    bt = _pick_batch_tile(B, per_row, fixed, budget)
    grid = (pl.cdiv(B, bt),)
    # NOTE: when B % bt != 0 the last block reads OOB embedding rows; those
    # rows only land in masked (out-of-array) output positions, so results for
    # valid rows are unaffected.  Do not change out_specs to expose them.

    vmem_limit = int(min(max(fixed + per_row * bt + (4 << 20), 32 << 20),
                         (vmem_cap * 3) // 4))

    bytes_accessed = (2 * B * S * Dp * in_itemsize + Kpad * Dp * 4   # inputs
                      + 2 * B * Dp * 4 + 2 * B * Kpad * 4)           # outputs
    flops = (2 * (2 * B) * Dp * Kpad      # fused similarity matmul
             + 2 * B * S * Dp             # seq-max pooling
             + 8 * B * Dp)                # l2 normalize
    cost = pl.CostEstimate(flops=int(flops), transcendentals=int(2 * B),
                           bytes_accessed=int(bytes_accessed))

    return pl.pallas_call(
        _sim_kernel,
        out_shape=(
            jax.ShapeDtypeStruct((2, B, Dp), jnp.float32),    # embed norms
            jax.ShapeDtypeStruct((2, B, Kpad), jnp.float32),  # similarities
        ),
        grid_spec=pltpu.PrefetchScalarGridSpec(
            num_scalar_prefetch=0,
            grid=grid,
            in_specs=[
                pl.BlockSpec((bt, S, Dp), lambda i: (i, 0, 0)),
                pl.BlockSpec((bt, S, Dp), lambda i: (i, 0, 0)),
                pl.BlockSpec((Kpad, Dp), lambda i: (0, 0)),
            ],
            out_specs=(
                pl.BlockSpec((2, bt, Dp), lambda i: (0, i, 0)),
                pl.BlockSpec((2, bt, Kpad), lambda i: (0, i, 0)),
            ),
        ),
        compiler_params=pltpu.CompilerParams(
            dimension_semantics=("parallel",),
            vmem_limit_bytes=vmem_limit),
        cost_estimate=cost,
    )(text_embed, img_embed, key_norm_pad)


# ---------------------------------------------------------------------------
# Full forward (glue in plain JAX around the single Pallas kernel)
# ---------------------------------------------------------------------------
@functools.partial(jax.jit, static_argnames=("text_key_size", "top_k"))
def dual_key_prompt_forward(text_embed, img_embed, prompt, general_prompt,
                            text_prompt_key, img_prompt_key,
                            *, text_key_size, top_k):
    B, S, D = text_embed.shape
    length = prompt.shape[1]
    Kt = text_prompt_key.shape[0]
    Ki = img_prompt_key.shape[0]
    Ktotal = Kt + Ki

    # Lane-dense padding: D to a multiple of 128 (only when needed), keys to
    # 128 (small pools) or a multiple of 256 (fills the 256-wide v6e/v7x MXU).
    Dp = D if D % 128 == 0 else _round_up(D, 128)
    Kpad = 128 if Ktotal <= 128 else _round_up(Ktotal, 256)

    # Key L2-norm is batch-invariant and tiny (Ktotal x D): do it in plain XLA
    # so the kernel has no grid-invariant output and its batch axis can be
    # "parallel" (sharded across v7x's two TensorCores).
    keys_cat = jnp.concatenate([text_prompt_key.astype(jnp.float32),
                                img_prompt_key.astype(jnp.float32)], axis=0)
    key_norm = _l2_normalize(keys_cat, axis=1)                  # (Ktotal, D)
    key_norm_pad = jnp.pad(key_norm, ((0, Kpad - Ktotal), (0, Dp - D)))

    if Dp != D:
        text_embed_k = jnp.pad(text_embed, ((0, 0), (0, 0), (0, Dp - D)))
        img_embed_k = jnp.pad(img_embed, ((0, 0), (0, 0), (0, Dp - D)))
    else:
        text_embed_k, img_embed_k = text_embed, img_embed

    embed_norms, sims = _run_sim_kernel(text_embed_k, img_embed_k, key_norm_pad)

    text_embed_norm = embed_norms[0, :, :D]       # (B, D)
    img_embed_norm = embed_norms[1, :, :D]        # (B, D)
    text_prompt_norm = key_norm[:Kt]              # (Kt, D)
    img_prompt_norm = key_norm[Kt:]               # (Ki, D)
    text_similarity = sims[0, :, :Kt]             # (B, Kt)
    img_similarity = sims[1, :, Kt:Ktotal]        # (B, Ki)

    # prompt_mask is None: top-k selection.
    top_text_vals, text_idx = jax.lax.top_k(text_similarity, top_k)
    top_img_vals, image_idx = jax.lax.top_k(img_similarity, top_k)
    if top_k == 1:
        # Faithful to the reference: stride is text_key_size (the module
        # writes `text_idx * self.text_key_size + image_idx`; identical to a
        # row-major stride whenever text_key_size == image_key_size).
        idx = text_idx * text_key_size + image_idx            # (B, 1)
    else:
        # Reference's fixed three-way combination (requires top_k >= 2).
        idx1 = text_idx[:, 0] * text_key_size + image_idx[:, 0]
        idx2 = text_idx[:, 1] * text_key_size + image_idx[:, 0]
        idx3 = text_idx[:, 0] * text_key_size + image_idx[:, 1]
        idx = jnp.stack([idx1, idx2, idx3], axis=-1)          # (B, 3)

    n_sel = idx.shape[1]
    batched_prompt_raw = jnp.take(prompt, idx, axis=0)        # (B, n_sel, L, D)
    batched_prompt = batched_prompt_raw.reshape(B, n_sel * length, D)
    batched_general = jnp.broadcast_to(
        general_prompt[None, :, :], (B,) + general_prompt.shape)
    batched_prompt = jnp.concatenate([batched_general, batched_prompt], axis=1)

    batched_text_key_norm = jnp.take(text_prompt_norm, text_idx, axis=0)  # (B,K,D)
    batched_img_key_norm = jnp.take(img_prompt_norm, image_idx, axis=0)   # (B,K,D)

    # reduce_sim == mean over batch of the selected cosine similarities, which
    # are exactly the top-k values already computed -> no extra kernel.
    reduce_sim = (jnp.sum(top_text_vals) + jnp.sum(top_img_vals)) / B

    # Keep the big prompted-embedding tensors in the embeddings' storage dtype.
    prompt_cast = batched_prompt.astype(text_embed.dtype)
    # TODO(synk): these two concats re-read/re-write the full embeddings in
    # HBM; with a fixed total_prompt_len the caller could preallocate the
    # prompted buffers and write the embeddings there directly (aliasing).

    out = {}
    out["prompt_idx"] = idx
    out["image_idx"] = image_idx
    out["text_idx"] = text_idx
    out["text_prompt_norm"] = text_prompt_norm
    out["img_prompt_norm"] = img_prompt_norm
    out["text_embed_norm"] = text_embed_norm
    out["img_embed_norm"] = img_embed_norm
    out["selected_text_key"] = batched_text_key_norm
    out["selected_img_key"] = batched_img_key_norm
    out["reduce_diff"] = 0
    out["reduce_sim"] = reduce_sim
    out["total_prompt_len"] = batched_prompt.shape[1]
    out["text_prompted_embedding"] = jnp.concatenate(
        [prompt_cast, text_embed], axis=1)
    out["img_prompted_embedding"] = jnp.concatenate(
        [prompt_cast, img_embed], axis=1)
    out["batched_prompt"] = batched_prompt
    out["modified"] = False
    return out


# ---------------------------------------------------------------------------
# Main
# ---------------------------------------------------------------------------
if __name__ == "__main__":
    # Small, module-consistent shapes.
    B = 2                    # batch
    S = 8                    # sequence length (text & image tokens)
    D = 32                   # embed_dim
    length = 5               # prompt length
    general_prompt_length = 10
    text_key_size = 4
    image_key_size = 4
    pool_size = image_key_size * text_key_size
    top_k = 1

    key = jax.random.PRNGKey(0)
    k_gen, k_pool, k_tkey, k_ikey, k_text, k_img = jax.random.split(key, 6)

    # Deterministic "parameters" mirroring __init__ (kept in f32):
    general_prompt = jax.random.normal(
        k_gen, (general_prompt_length, D), jnp.float32)          # randn
    prompt = jax.random.uniform(
        k_pool, (pool_size, length, D), jnp.float32, -1.0, 1.0)  # uniform(-1,1)
    text_prompt_key = jax.random.uniform(
        k_tkey, (text_key_size, D), jnp.float32, -1.0, 1.0)      # uniform(-1,1)
    img_prompt_key = jax.random.uniform(
        k_ikey, (image_key_size, D), jnp.float32, -1.0, 1.0)     # uniform(-1,1)

    # Activations in bf16 (storage/DMA dtype): halves the kernel's dominant
    # HBM read traffic; all math inside the kernel stays f32.
    text_embed = jax.random.normal(k_text, (B, S, D), jnp.bfloat16)
    img_embed = jax.random.normal(k_img, (B, S, D), jnp.bfloat16)

    out = dual_key_prompt_forward(
        text_embed, img_embed, prompt, general_prompt,
        text_prompt_key, img_prompt_key,
        text_key_size=text_key_size, top_k=top_k)

    jax.block_until_ready(out["reduce_sim"])
    jax.block_until_ready(out["text_prompted_embedding"])
    jax.block_until_ready(out["img_prompted_embedding"])

    assert out["batched_prompt"].shape == (
        B, general_prompt_length + top_k * length, D)
    assert out["text_prompted_embedding"].shape == (
        B, general_prompt_length + top_k * length + S, D)
    assert out["selected_text_key"].shape == (B, top_k, D)
    print("KERNEL_OK")
</pallas_src>

<mosaic_0001>
module attributes {stable_mosaic.version = 11 : i64} {
  func.func @_sim_kernel(%arg0: i32, %arg1: memref<2x8x128xbf16, #tpu.memory_space<vmem>>, %arg2: memref<2x8x128xbf16, #tpu.memory_space<vmem>>, %arg3: memref<128x128xf32, #tpu.memory_space<vmem>>, %arg4: memref<2x2x128xf32, #tpu.memory_space<vmem>>, %arg5: memref<2x2x128xf32, #tpu.memory_space<vmem>>) attributes {dimension_semantics = [#tpu.dimension_semantics<parallel>], iteration_bounds = array<i64: 1>, scalar_prefetch = 0 : i64, scratch_operands = 0 : i64, tpu.core_type = #tpu.core_type<tc>, window_params = [{transform_indices = @transform_0, window_bounds = array<i64: 2, 8, 128>}, {transform_indices = @transform_1, window_bounds = array<i64: 2, 8, 128>}, {pipeline_mode = #tpu.pipeline_mode<synchronous>, transform_indices = @transform_2, window_bounds = array<i64: 128, 128>}, {transform_indices = @transform_3, window_bounds = array<i64: 2, 2, 128>}, {transform_indices = @transform_4, window_bounds = array<i64: 2, 2, 128>}]} {
    %c0 = arith.constant 0 : index
    %c0_0 = arith.constant 0 : index
    %c0_1 = arith.constant 0 : index
    %0 = vector.load %arg1[%c0, %c0_0, %c0_1] : memref<2x8x128xbf16, #tpu.memory_space<vmem>>, vector<2x8x128xbf16>
    %1 = arith.extf %0 : vector<2x8x128xbf16> to vector<2x8x128xf32>
    %cst = arith.constant dense<0xFF800000> : vector<2x128xf32>
    %2 = vector.multi_reduction <maximumf>, %1, %cst [1] : vector<2x8x128xf32> to vector<2x128xf32>
    %c0_2 = arith.constant 0 : index
    %c0_3 = arith.constant 0 : index
    %c0_4 = arith.constant 0 : index
    %3 = vector.load %arg2[%c0_2, %c0_3, %c0_4] : memref<2x8x128xbf16, #tpu.memory_space<vmem>>, vector<2x8x128xbf16>
    %4 = arith.extf %3 : vector<2x8x128xbf16> to vector<2x8x128xf32>
    %cst_5 = arith.constant dense<0xFF800000> : vector<2x128xf32>
    %5 = vector.multi_reduction <maximumf>, %4, %cst_5 [1] : vector<2x8x128xf32> to vector<2x128xf32>
    %6 = tpu.concatenate %2, %5 in 0 : vector<2x128xf32>, vector<2x128xf32> -> vector<4x128xf32>
    %7 = arith.mulf %6, %6 : vector<4x128xf32>
    %cst_6 = arith.constant dense<0.000000e+00> : vector<4xf32>
    %8 = vector.multi_reduction <add>, %7, %cst_6 [1] : vector<4x128xf32> to vector<4xf32>
    %9 = vector.shape_cast %8 : vector<4xf32> to vector<4x1xf32>
    %cst_7 = arith.constant 9.99999996E-13 : f32
    %10 = vector.broadcast %cst_7 : f32 to vector<4x1xf32>
    %11 = arith.maximumf %9, %10 : vector<4x1xf32>
    %12 = math.rsqrt %11 : vector<4x1xf32>
    %13 = vector.broadcast %12 : vector<4x1xf32> to vector<4x128xf32>
    %14 = arith.mulf %6, %13 : vector<4x128xf32>
    %c0_8 = arith.constant 0 : index
    %c0_9 = arith.constant 0 : index
    %15 = vector.load %arg3[%c0_8, %c0_9] : memref<128x128xf32, #tpu.memory_space<vmem>>, vector<128x128xf32>
    %cst_10 = arith.constant dense<0.000000e+00> : vector<4x128xf32>
    %16 = tpu.matmul %14, %15, %cst_10 {dimension_numbers = #tpu.dot_dimension_numbers<[1], [1], [0], [0], [0, 0, 1, 0], [], []>} : vector<4x128xf32>, vector<128x128xf32>, vector<4x128xf32> -> vector<4x128xf32>
    %17 = vector.extract_strided_slice %14 {offsets = [0, 0], sizes = [2, 128], strides = [1, 1]} : vector<4x128xf32> to vector<2x128xf32>
    %c0_11 = arith.constant 0 : index
    %c0_12 = arith.constant 0 : index
    %c0_13 = arith.constant 0 : index
    %18 = vector.load %arg4[%c0_11, %c0_12, %c0_13] : memref<2x2x128xf32, #tpu.memory_space<vmem>>, vector<1x2x128xf32>
    %19 = vector.shape_cast %18 : vector<1x2x128xf32> to vector<2x128xf32>
    %20 = vector.shape_cast %17 : vector<2x128xf32> to vector<1x2x128xf32>
    tpu.vector_store %arg4[%c0_11, %c0_12, %c0_13], %20 {strides = array<i32>} : memref<2x2x128xf32, #tpu.memory_space<vmem>>, vector<1x2x128xf32>,
    %21 = vector.extract_strided_slice %14 {offsets = [2, 0], sizes = [2, 128], strides = [1, 1]} : vector<4x128xf32> to vector<2x128xf32>
    %c1 = arith.constant 1 : index
    %c0_14 = arith.constant 0 : index
    %c0_15 = arith.constant 0 : index
    %22 = vector.load %arg4[%c1, %c0_14, %c0_15] : memref<2x2x128xf32, #tpu.memory_space<vmem>>, vector<1x2x128xf32>
    %23 = vector.shape_cast %22 : vector<1x2x128xf32> to vector<2x128xf32>
    %24 = vector.shape_cast %21 : vector<2x128xf32> to vector<1x2x128xf32>
    tpu.vector_store %arg4[%c1, %c0_14, %c0_15], %24 {strides = array<i32>} : memref<2x2x128xf32, #tpu.memory_space<vmem>>, vector<1x2x128xf32>,
    %25 = vector.extract_strided_slice %16 {offsets = [0, 0], sizes = [2, 128], strides = [1, 1]} : vector<4x128xf32> to vector<2x128xf32>
    %c0_16 = arith.constant 0 : index
    %c0_17 = arith.constant 0 : index
    %c0_18 = arith.constant 0 : index
    %26 = vector.load %arg5[%c0_16, %c0_17, %c0_18] : memref<2x2x128xf32, #tpu.memory_space<vmem>>, vector<1x2x128xf32>
    %27 = vector.shape_cast %26 : vector<1x2x128xf32> to vector<2x128xf32>
    %28 = vector.shape_cast %25 : vector<2x128xf32> to vector<1x2x128xf32>
    tpu.vector_store %arg5[%c0_16, %c0_17, %c0_18], %28 {strides = array<i32>} : memref<2x2x128xf32, #tpu.memory_space<vmem>>, vector<1x2x128xf32>,
    %29 = vector.extract_strided_slice %16 {offsets = [2, 0], sizes = [2, 128], strides = [1, 1]} : vector<4x128xf32> to vector<2x128xf32>
    %c1_19 = arith.constant 1 : index
    %c0_20 = arith.constant 0 : index
    %c0_21 = arith.constant 0 : index
    %30 = vector.load %arg5[%c1_19, %c0_20, %c0_21] : memref<2x2x128xf32, #tpu.memory_space<vmem>>, vector<1x2x128xf32>
    %31 = vector.shape_cast %30 : vector<1x2x128xf32> to vector<2x128xf32>
    %32 = vector.shape_cast %29 : vector<2x128xf32> to vector<1x2x128xf32>
    tpu.vector_store %arg5[%c1_19, %c0_20, %c0_21], %32 {strides = array<i32>} : memref<2x2x128xf32, #tpu.memory_space<vmem>>, vector<1x2x128xf32>,
    return
  }
  func.func @transform_0(%arg0: i32) -> (i32, i32, i32) {
    %c0_i32 = arith.constant 0 : i32
    %c0_i32_0 = arith.constant 0 : i32
    %c0_i32_1 = arith.constant 0 : i32
    return %arg0, %c0_i32, %c0_i32_0 : i32, i32, i32
  }
  func.func @transform_1(%arg0: i32) -> (i32, i32, i32) {
    %c0_i32 = arith.constant 0 : i32
    %c0_i32_0 = arith.constant 0 : i32
    %c0_i32_1 = arith.constant 0 : i32
    return %arg0, %c0_i32, %c0_i32_0 : i32, i32, i32
  }
  func.func @transform_2(%arg0: i32) -> (i32, i32) {
    %c0_i32 = arith.constant 0 : i32
    %c0_i32_0 = arith.constant 0 : i32
    %c0_i32_1 = arith.constant 0 : i32
    return %c0_i32, %c0_i32_0 : i32, i32
  }
  func.func @transform_3(%arg0: i32) -> (i32, i32, i32) {
    %c0_i32 = arith.constant 0 : i32
    %c0_i32_0 = arith.constant 0 : i32
    %c0_i32_1 = arith.constant 0 : i32
    return %c0_i32, %arg0, %c0_i32_0 : i32, i32, i32
  }
  func.func @transform_4(%arg0: i32) -> (i32, i32, i32) {
    %c0_i32 = arith.constant 0 : i32
    %c0_i32_0 = arith.constant 0 : i32
    %c0_i32_1 = arith.constant 0 : i32
    return %c0_i32, %arg0, %c0_i32_0 : i32, i32, i32
  }
}

</mosaic_0001>

<bundles_post_ra>
// kernel: dual_key_prompt_forward.1
= control target key start
LH: loop header
LB: loop body
LE: loop exit
PB: predicated region body
PF: predicated region fallthrough
CT: control target
= control target key end

     0   :  { %v259_v7 = vmov 0.0|0.0   ;;  %vm50_vm0 = vcmask 1041409   ;;  %vm55_vm1 = vcmask 1043459   ;;  %vm58_vm2 = vcmask 1041408   ;;  %s358_s0 = inlined_call_operand.vmem [shape: bf16[2,8,128], index: 0, kind: input, shape index: {}]   ;;  %s359_s1 = inlined_call_operand.vmem [shape: bf16[2,8,128], index: 1, kind: input, shape index: {}]   ;;  %s360_s2 = inlined_call_operand.vmem [shape: f32[128,128], index: 2, kind: input, shape index: {}]   ;;  %s361_s3 = inlined_call_operand.vmem [shape: f32[2,2,128], index: 3, kind: output, shape index: {0}]   ;;  %s362_s4 = inlined_call_operand.vmem [shape: f32[2,2,128], index: 4, kind: output, shape index: {1}]  }
   0x1   :  { %v171_v0 = vld [vmem:[%s358_s0] sm:$0xff]   ;;  %230 = vmatprep.subr.bf16.mxu0 %v259_v7  ;;  %v69_v8 = vld [vmem:[%s360_s2 + $0x8] sm:$0xff]  ;;  %v70_v18 = vld [vmem:[%s360_s2 + $0x10] sm:$0xff]  ;;  %vm61_vm3 = vcmask 1043456   ;;  %vm260_vm4 = vmmov 0   ;;  %v261_v53 = vmov 0.0  }
   0x2   :  { %v175_v1 = vld [vmem:[%s359_s1] sm:$0xff]   ;;  %v172_v3 = vunpack.c.l.bf16 %v171_v0  ;;  %v173_v4 = vunpack.c.h.bf16 %v171_v0  ;;  %v71_v19 = vld [vmem:[%s360_s2 + $0x18] sm:$0xff]  ;;  %v73_v38 = vld [vmem:[%s360_s2 + $0x28] sm:$0xff]  ;;  %227 = vmatprep.mubr.msk.f32.mxu0 %vm260_vm4, %v261_v53 }
   0x3   :  { %v68_v2 = vld [vmem:[%s360_s2] sm:$0xff]  ;;  %v176_v5 = vunpack.c.l.bf16 %v175_v1  ;;  %v177_v6 = vunpack.c.h.bf16 %v175_v1  ;;  %v234_v24 = vpack.c.bf16 %v71_v19, %v70_v18  ;;  %v74_v45 = vld [vmem:[%s360_s2 + $0x30] sm:$0xff]  ;;  %v75_v46 = vld [vmem:[%s360_s2 + $0x38] sm:$0xff] }
   0x4   :  { %v231_v9 = vpack.c.bf16 %v69_v8, %v68_v2  ;;  %v20_v10 = vrot.slane %v172_v3, 4  ;;  %v26_v11 = vrot.slane %v173_v4, 4  ;;  %v72_v37 = vld [vmem:[%s360_s2 + $0x20] sm:$0xff]  ;;  %v240_v47 = vpack.c.bf16 %v75_v46, %v74_v45  ;;  %v77_v49 = vld [vmem:[%s360_s2 + $0x48] sm:$0xff]  ;;  %v78_v51 = vld [vmem:[%s360_s2 + $0x50] sm:$0xff] }
   0x5   :  { %v36_v12 = vrot.slane %v176_v5, 4  ;;  %v42_v13 = vrot.slane %v177_v6, 4  ;;  %v237_v42 = vpack.c.bf16 %v73_v38, %v72_v37  ;;  %v76_v48 = vld [vmem:[%s360_s2 + $0x40] sm:$0xff]  ;;  %v79_v52 = vld [vmem:[%s360_s2 + $0x58] sm:$0xff]  ;;  %v81_v56 = vld [vmem:[%s360_s2 + $0x68] sm:$0xff] }
   0x6   :  { %232 = vmatpush3.bf16.xpose.msra.mxu0 %v231_v9  ;;  %v21_v14 = vmax.f32 %v172_v3, %v20_v10  ;;  %v27_v15 = vmax.f32 %v173_v4, %v26_v11  ;;  %v243_v50 = vpack.c.bf16 %v77_v49, %v76_v48  ;;  %v246_v54 = vpack.c.bf16 %v79_v52, %v78_v51  ;;  %v80_v55 = vld [vmem:[%s360_s2 + $0x60] sm:$0xff]  ;;  %v82_v58 = vld [vmem:[%s360_s2 + $0x70] sm:$0xff]  ;;  %v83_v59 = vld [vmem:[%s360_s2 + $0x78] sm:$0xff] }
   0x7   :  { %v37_v16 = vmax.f32 %v176_v5, %v36_v12  ;;  %v43_v17 = vmax.f32 %v177_v6, %v42_v13  ;;  %233 = vmatprep.subr.bf16.mxu0 %v259_v7  ;;  %v249_v57 = vpack.c.bf16 %v81_v56, %v80_v55  ;;  %v252_v60 = vpack.c.bf16 %v83_v59, %v82_v58 }
   0x8   :  { %v22_v20 = vrot.slane %v21_v14, 2  ;;  %v28_v21 = vrot.slane %v27_v15, 2 }
   0x9   :  { %v38_v22 = vrot.slane %v37_v16, 2  ;;  %v44_v23 = vrot.slane %v43_v17, 2 }
   0xa   :  { %v23_v25 = vmax.f32 %v21_v14, %v22_v20  ;;  %v29_v26 = vmax.f32 %v27_v15, %v28_v21 }
   0xb   :  { %v39_v27 = vmax.f32 %v37_v16, %v38_v22  ;;  %v45_v28 = vmax.f32 %v43_v17, %v44_v23 }
   0xc   :  { %v24_v29 = vrot.slane %v23_v25, 1  ;;  %v30_v30 = vrot.slane %v29_v26, 1 }
   0xd   :  { %v40_v31 = vrot.slane %v39_v27, 1  ;;  %v46_v32 = vrot.slane %v45_v28, 1 }
   0xe   :  { %235 = vmatpush3.bf16.xpose.msra.mxu0 %v234_v24  ;;  %v25_v33 = vmax.f32 %v23_v25, %v24_v29  ;;  %v31_v34 = vmax.f32 %v29_v26, %v30_v30 }
   0xf   :  { %v41_v35 = vmax.f32 %v39_v27, %v40_v31  ;;  %v47_v36 = vmax.f32 %v45_v28, %v46_v32  ;;  %236 = vmatprep.subr.bf16.mxu0 %v259_v7 }
  0x10   :  { %v51_v39 = vsel %vm50_vm0, %v31_v34, %v25_v33 }
  0x11   :  { %v56_v40 = vsel %vm55_vm1, %v47_v36, %v41_v35 }
  0x12   :  { %v59_v41 = vsel %vm58_vm2, %v51_v39, %v56_v40 }
  0x13   :  { %v60_v43 = vmul.f32 %v59_v41, %v59_v41 }
  0x15   :  { %v62_v44 = vsel %vm61_vm3, %v60_v43, 0.0 }
  0x16   :  { %63 = vadd.xlane.f32.xlu0 %v62_v44  ;;  %238 = vmatpush3.bf16.xpose.msra.mxu0 %v237_v42 }
  0x17   :  { %239 = vmatprep.subr.bf16.mxu0 %v259_v7 }
  0x1e   :  { %241 = vmatpush3.bf16.xpose.msra.mxu0 %v240_v47 }
  0x1f   :  { %242 = vmatprep.subr.bf16.mxu0 %v259_v7 }
  0x26   :  { %244 = vmatpush3.bf16.xpose.msra.mxu0 %v243_v50 }
  0x27   :  { %245 = vmatprep.subr.bf16.mxu0 %v259_v7 }
  0x2e   :  { %247 = vmatpush3.bf16.xpose.msra.mxu0 %v246_v54 }
  0x2f   :  { %248 = vmatprep.subr.bf16.mxu0 %v259_v7 }
  0x36   :  { %250 = vmatpush3.bf16.xpose.msra.mxu0 %v249_v57 }
  0x37   :  { %251 = vmatprep.subr.bf16.mxu0 %v259_v7 }
  0x3e   :  { %253 = vmatpush3.bf16.xpose.msra.mxu0 %v252_v60 }
  0xa3   :  { %v64_v61 = vpop.xlane.xlu0 %63 }
  0xa4   :  { %v65_v62 = vmax.f32 %v64_v61, 1e-12 }
  0xa6   :  { %257 = vrsqrt.f32 %v65_v62 }
  0xb0   :  { %v258_v63 = vpop.eup %257 }
  0xb1   :  { %v67_v0 = vmul.f32 %v258_v63, %v59_v41 }
  0xb3   :  { %228 = vmatmul.mubr.f32.vlgmr.msra.gmra.mrb[0].mxu0 %v67_v0  ;;  %154 = vst [vmem:[%s361_s3] sm:$0xf] %v67_v0  }
 0x186   :  { %v150_v1 = vpop.f32.mrb[0].mxu0 }
 0x187   :  { %157 = vst [vmem:[%s362_s4] sm:$0x3] %v150_v1  ;;  %169 = vst [vmem:[%s362_s4] sm:$0xc] %v150_v1  ;;  %v229_v2 = vpop.f32.mrb[1].mxu0 }

</bundles_post_ra>
